<compile_context>
chip_gen: v7x
topology: tpu7x:2x2x1
jax: 0.10.0
libtpu: 0.0.40
codegen_flags: <defaults>
</compile_context>

<pallas_src>
import functools
import math

import jax
import jax.numpy as jnp
from jax import lax
from jax.experimental import pallas as pl
from jax.experimental.pallas import tpu as pltpu


# ---------------------------------------------------------------------------
# Glue: filter-bank generation (rotation + cyclic shift) in plain JAX.
# rot_img reproduces torch F.affine_grid + F.grid_sample (bilinear, zero
# padding, align_corners=False).
# ---------------------------------------------------------------------------
def rot_img(w, theta):
    """Bilinear rotation of (N, C, H, W) filters by angle theta."""
    N, C, H, W = w.shape
    cos_t = jnp.cos(jnp.float32(theta))
    sin_t = jnp.sin(jnp.float32(theta))
    xs = (jnp.arange(W, dtype=jnp.float32) * 2.0 + 1.0) / W - 1.0
    ys = (jnp.arange(H, dtype=jnp.float32) * 2.0 + 1.0) / H - 1.0
    gy, gx = jnp.meshgrid(ys, xs, indexing="ij")  # (H, W)
    sx = cos_t * gx - sin_t * gy
    sy = sin_t * gx + cos_t * gy
    ix = ((sx + 1.0) * W - 1.0) / 2.0
    iy = ((sy + 1.0) * H - 1.0) / 2.0
    ix0 = jnp.floor(ix)
    iy0 = jnp.floor(iy)
    ix1 = ix0 + 1.0
    iy1 = iy0 + 1.0
    wx1 = ix - ix0
    wx0 = 1.0 - wx1
    wy1 = iy - iy0
    wy0 = 1.0 - wy1

    def sample(iyf, ixf):
        iyi = iyf.astype(jnp.int32)
        ixi = ixf.astype(jnp.int32)
        valid = ((iyi >= 0) & (iyi < H) & (ixi >= 0) & (ixi < W)).astype(w.dtype)
        iyc = jnp.clip(iyi, 0, H - 1)
        ixc = jnp.clip(ixi, 0, W - 1)
        vals = w[:, :, iyc, ixc]  # (N, C, H, W)
        return vals * valid[None, None]

    out = (sample(iy0, ix0) * (wy0 * wx0)[None, None]
           + sample(iy0, ix1) * (wy0 * wx1)[None, None]
           + sample(iy1, ix0) * (wy1 * wx0)[None, None]
           + sample(iy1, ix1) * (wy1 * wx1)[None, None])
    return out


def generate_filter_bank(kernel, nfb, out_c, in_c, go, ksz):
    """(nfb, out, in, go, k, k) -> (nfb, out, go_rot, in, go, k, k)."""
    weights = kernel.reshape(nfb * out_c * in_c, go, ksz, ksz)
    banks = []
    for i in range(go):
        rotated = rot_img(weights, -math.pi * 2.0 / go * i)
        # jnp.roll(arange, i) shifts right by i, same convention as torch.roll.
        shifted_idx = jnp.roll(jnp.arange(go), i)
        shifted = rotated[:, shifted_idx]
        banks.append(shifted.reshape(nfb, out_c, in_c, go, ksz, ksz))
    fb = jnp.stack(banks)  # (go_rot, nfb, out, in, go, k, k)
    return jnp.transpose(fb, (1, 2, 0, 3, 4, 5, 6))  # (nfb, out, go_rot, in, go, k, k)


def relaxed_conv_weights_oihw(kernel, relaxed_weights):
    """Mix filter banks with relaxed weights -> conv weight (O*G, I*G, k, k)."""
    nfb, out_c, in_c, go, ksz, _ = kernel.shape
    fb = generate_filter_bank(kernel, nfb, out_c, in_c, go, ksz)
    # 'na, aon... -> on...'
    w = jnp.einsum("na,aonigxy->onigxy", relaxed_weights, fb)
    return w.reshape(out_c * go, in_c * go, ksz, ksz)


# ---------------------------------------------------------------------------
# Pallas kernel: one deep bf16 GEMM per (batch, pixel-tile) grid step.
# ---------------------------------------------------------------------------
def _conv_gemm_kernel(w_ref, x_ref, o_ref, *, apply_act, slope):
    # w_ref: (Cout, Kp) bf16  -- resident across the whole grid
    # x_ref: (Kp,  P)   bf16  -- im2col^T tile: contraction on sublanes, pixels on lanes
    # o_ref: (Cout, P)  f32   -- NCHW-flat output tile (lane-dense store)
    acc = jnp.dot(w_ref[...], x_ref[...], preferred_element_type=jnp.float32)
    if apply_act:
        acc = jnp.where(acc >= 0, acc, slope * acc)
    o_ref[...] = acc.astype(o_ref.dtype)


def _pick_pixel_tile(hw, batch):
    """Largest lane-dense pixel tile (multiple of 128) dividing HW evenly while
    keeping at least 2 total pipeline steps (batch axis counts)."""
    for p in (1024, 512, 256, 128):
        if hw % p == 0 and batch * (hw // p) >= 2:
            return p
    return 128   # HW not a multiple of 128 (or tiny): pad up to one 128-lane tile


def rui_r_group_conv_cn(x, kernel, relaxed_weights, *, activation=True,
                        negative_slope=0.01):
    """Forward pass of RuiRGroupConvCn.

    x:               (B, in_channels, group_order, H, W)
    kernel:          (nfb, out_channels, in_channels, group_order, k, k)
    relaxed_weights: (group_order, nfb)
    returns:         (B, out_channels, group_order, H, W) float32
    """
    nfb, out_c, in_c, go, K, _ = kernel.shape
    B = x.shape[0]
    H, W = x.shape[3], x.shape[4]
    p = (K - 1) // 2
    Cin = in_c * go
    Cout = out_c * go
    Kp = Cin * K * K          # folded contraction depth (cin, kh, kw)
    HW = H * W

    # ---- parameter glue: mixed conv weight -> (Cout, Cin*K*K) in bf16 --------
    w_oihw = relaxed_conv_weights_oihw(kernel, relaxed_weights)   # (Cout, Cin, K, K)
    w_mat = w_oihw.reshape(Cout, Kp).astype(jnp.bfloat16)         # (cin, kh, kw)-major

    # ---- input: NCHW -> zero pad -> im2col^T (B, Kp, HW), bf16, no transposes
    x_nchw = x.reshape(B, Cin, H, W).astype(jnp.bfloat16)
    xp = jnp.pad(x_nchw, ((0, 0), (0, 0), (p, p), (p, p)))
    taps = [lax.slice(xp, (0, 0, kh, kw), (B, Cin, kh + H, kw + W))
            for kh in range(K) for kw in range(K)]                # each (B, Cin, H, W)
    patches = jnp.stack(taps, axis=2).reshape(B, Kp, HW)          # (B, Cin*K*K, H*W)

    # ---- pixel tiling on the lane axis ---------------------------------------
    P = _pick_pixel_tile(HW, B)
    HWp = (-(-HW // P)) * P
    if HWp != HW:
        patches = jnp.pad(patches, ((0, 0), (0, 0), (0, HWp - HW)))

    kern = functools.partial(_conv_gemm_kernel, apply_act=activation,
                             slope=negative_slope)

    flops = int(2 * B * HWp * Kp * Cout)
    bytes_accessed = int((B * Kp * HWp * 2) + (Cout * Kp * 2) + (B * Cout * HWp * 4))

    out = pl.pallas_call(
        kern,
        out_shape=jax.ShapeDtypeStruct((B, Cout, HWp), jnp.float32),
        grid_spec=pltpu.PrefetchScalarGridSpec(
            num_scalar_prefetch=0,
            grid=(B, HWp // P),
            in_specs=[
                pl.BlockSpec((Cout, Kp), lambda b, t: (0, 0)),               # resident weight
                pl.BlockSpec((pl.Squeezed(), Kp, P), lambda b, t: (b, 0, t)),
            ],
            out_specs=pl.BlockSpec((pl.Squeezed(), Cout, P), lambda b, t: (b, 0, t)),
        ),
        compiler_params=pltpu.CompilerParams(
            dimension_semantics=("parallel", "parallel"),
            vmem_limit_bytes=32 * 1024 * 1024,   # per-step footprint < 1 MiB; fits v5e/v6e/v7x
        ),
        cost_estimate=pl.CostEstimate(flops=flops, transcendentals=0,
                                      bytes_accessed=bytes_accessed),
    )(w_mat, patches)

    if HWp != HW:
        out = out[:, :, :HW]
    return out.reshape(B, out_c, go, H, W)    # already NCHW -> just split dims


# ---------------------------------------------------------------------------
# Pure-JAX reference with matching bf16-input / f32-accumulate numerics.
# ---------------------------------------------------------------------------
def reference_forward(x, kernel, relaxed_weights, activation=True,
                      negative_slope=0.01):
    nfb, out_c, in_c, go, K, _ = kernel.shape
    B, _, _, H, W = x.shape
    p = (K - 1) // 2
    w_oihw = relaxed_conv_weights_oihw(kernel, relaxed_weights).astype(jnp.bfloat16)
    xb = x.reshape(B, in_c * go, H, W).astype(jnp.bfloat16)
    y = lax.conv_general_dilated(
        xb, w_oihw, (1, 1), [(p, p), (p, p)],
        dimension_numbers=("NCHW", "OIHW", "NCHW"),
        preferred_element_type=jnp.float32,
        precision=lax.Precision.HIGHEST)
    y = y.reshape(B, out_c, go, H, W)
    if activation:
        y = jnp.where(y >= 0, y, negative_slope * y)
    return y


if __name__ == "__main__":
    # small, module-consistent shapes
    B, in_c, out_c, go, K, nfb = 2, 4, 8, 4, 3, 2
    H = W = 16

    key = jax.random.PRNGKey(0)
    k1, k2, k3 = jax.random.split(key, 3)
    bound = 1.0 / math.sqrt(in_c * go * K * K)  # kaiming-uniform-ish, deterministic
    kernel = jax.random.uniform(k1, (nfb, out_c, in_c, go, K, K),
                                jnp.float32, -bound, bound)
    # __init__ sets ones; perturb deterministically so banks are weighted differently
    relaxed_weights = (jnp.ones((go, nfb), jnp.float32)
                       + 0.1 * jax.random.normal(k2, (go, nfb), jnp.float32))
    x = jax.random.normal(k3, (B, in_c, go, H, W), jnp.float32)

    y = rui_r_group_conv_cn(x, kernel, relaxed_weights, activation=True)
    y = jax.block_until_ready(y)

    y_ref = reference_forward(x, kernel, relaxed_weights, activation=True)
    assert y.shape == (B, out_c, go, H, W)
    assert jnp.allclose(y, y_ref, atol=2e-3, rtol=2e-3), "mismatch vs reference"

    print("KERNEL_OK")
</pallas_src>

<mosaic_0001>
module attributes {stable_mosaic.version = 11 : i64} {
  func.func @_conv_gemm_kernel(%arg0: i32, %arg1: i32, %arg2: memref<32x144xbf16, #tpu.memory_space<vmem>>, %arg3: memref<1x144x256xbf16, #tpu.memory_space<vmem>>, %arg4: memref<1x32x256xf32, #tpu.memory_space<vmem>>) attributes {dimension_semantics = [#tpu.dimension_semantics<parallel>, #tpu.dimension_semantics<parallel>], iteration_bounds = array<i64: 2, 1>, scalar_prefetch = 0 : i64, scratch_operands = 0 : i64, tpu.core_type = #tpu.core_type<tc>, window_params = [{pipeline_mode = #tpu.pipeline_mode<synchronous>, transform_indices = @transform_0, window_bounds = array<i64: 32, 144>}, {transform_indices = @transform_1, window_bounds = array<i64: 1, 144, 256>}, {transform_indices = @transform_2, window_bounds = array<i64: 1, 32, 256>}]} {
    %c0 = arith.constant 0 : index
    %c0_0 = arith.constant 0 : index
    %0 = vector.load %arg2[%c0, %c0_0] : memref<32x144xbf16, #tpu.memory_space<vmem>>, vector<32x144xbf16>
    %c0_1 = arith.constant 0 : index
    %c0_2 = arith.constant 0 : index
    %c0_3 = arith.constant 0 : index
    %1 = vector.load %arg3[%c0_1, %c0_2, %c0_3] : memref<1x144x256xbf16, #tpu.memory_space<vmem>>, vector<1x144x256xbf16>
    %2 = vector.shape_cast %1 : vector<1x144x256xbf16> to vector<144x256xbf16>
    %cst = arith.constant dense<0.000000e+00> : vector<32x256xf32>
    %3 = tpu.matmul %0, %2, %cst {dimension_numbers = #tpu.dot_dimension_numbers<[1], [0], [0], [1], [0, 0, 1, 1], [], []>} : vector<32x144xbf16>, vector<144x256xbf16>, vector<32x256xf32> -> vector<32x256xf32>
    %cst_4 = arith.constant 0.000000e+00 : f32
    %4 = vector.broadcast %cst_4 : f32 to vector<32x256xf32>
    %5 = arith.cmpf oge, %3, %4 : vector<32x256xf32>
    %cst_5 = arith.constant 0.00999999977 : f32
    %6 = vector.broadcast %cst_5 : f32 to vector<32x256xf32>
    %7 = arith.mulf %6, %3 : vector<32x256xf32>
    %8 = arith.select %5, %3, %7 : vector<32x256xi1>, vector<32x256xf32>
    %c0_6 = arith.constant 0 : index
    %c0_7 = arith.constant 0 : index
    %c0_8 = arith.constant 0 : index
    %9 = vector.load %arg4[%c0_6, %c0_7, %c0_8] : memref<1x32x256xf32, #tpu.memory_space<vmem>>, vector<1x32x256xf32>
    %10 = vector.shape_cast %9 : vector<1x32x256xf32> to vector<32x256xf32>
    %11 = vector.shape_cast %8 : vector<32x256xf32> to vector<1x32x256xf32>
    tpu.vector_store %arg4[%c0_6, %c0_7, %c0_8], %11 {strides = array<i32>} : memref<1x32x256xf32, #tpu.memory_space<vmem>>, vector<1x32x256xf32>,
    return
  }
  func.func @transform_0(%arg0: i32, %arg1: i32) -> (i32, i32) {
    %c0_i32 = arith.constant 0 : i32
    %c0_i32_0 = arith.constant 0 : i32
    %c0_i32_1 = arith.constant 0 : i32
    return %c0_i32, %c0_i32_0 : i32, i32
  }
  func.func @transform_1(%arg0: i32, %arg1: i32) -> (i32, i32, i32) {
    %c0_i32 = arith.constant 0 : i32
    %c0_i32_0 = arith.constant 0 : i32
    return %arg0, %c0_i32, %arg1 : i32, i32, i32
  }
  func.func @transform_2(%arg0: i32, %arg1: i32) -> (i32, i32, i32) {
    %c0_i32 = arith.constant 0 : i32
    %c0_i32_0 = arith.constant 0 : i32
    return %arg0, %c0_i32, %arg1 : i32, i32, i32
  }
}

</mosaic_0001>

<bundles_post_ra>
// kernel: tpu_custom_call.1
= control target key start
LH: loop header
LB: loop body
LE: loop exit
PB: predicated region body
PF: predicated region fallthrough
CT: control target
= control target key end

     0   :  { %7 = vsyncpa [#allocation3], 0  ;;  %s1124_s0 = inlined_call_operand.hbm [shape: bf16[32,144], index: 0, kind: input, shape index: {}]   ;;  %s1125_s1 = inlined_call_operand.hbm [shape: bf16[2,144,256], index: 1, kind: input, shape index: {}]   ;;  %s1126_s2 = inlined_call_operand.hbm [shape: f32[2,32,256], index: 2, kind: output, shape index: {}]  }
   0x1   :  { %8 = vsyncpa [#allocation6], 0 }
   0x2   :  { %10 = vsyncpa [#allocation6 + $0x1], 0 }
   0x3   :  { %11 = vsyncpa [#allocation4], 0 }
   0x4   :  { %13 = vsyncpa [#allocation4 + $0x1], 0  ;;  %s873_s9 = smov 0   ;;  %s875_s10 = smov 0  }
   0x5   :  { %s877_s11 = smov 0   ;;  %s879_s12 = smov 0  }
   0x6   :  { %s881_s13 = smov 0   ;;  %s883_s14 = smov 0  }
   0x7 LB: > { %s535_s15 = sadd.s32 4294967295, %s849_s14   ;;  %s536_s16 = sadd.s32 4294967294, %s849_s14   ;;  %s849_s14 = sphi %s883_s14, %s19_s14   ;;  %s845_s13 = sphi %s881_s13, %s1149_s13   ;;  %s841_s12 = sphi %s879_s12, %s1148_s12   ;;  %s837_s11 = sphi %s877_s11, %s1147_s11   ;;  %s833_s10 = sphi %s875_s10, %s1146_s10   ;;  %s829_s9 = sphi %s873_s9, %s1145_s9  }
   0x8   : > { %p74_p0 = scmp.ne.s32.totalorder %s833_s10, %s829_s9  ;;  %p907_p1 = scmp.eq.s32.totalorder %s535_s15, 0 }
   0x9   : > { %p911_p2 = scmp.eq.s32.totalorder %s535_s15, 1  ;;  %p106_p3 = scmp.eq.s32.totalorder %s536_s16, 1 }
   0xa   : > { %s1131_s17 = scalar_select %p907_p1, 1, 0 }
   0xb   : > { %s1132_s18 = scalar_select %p911_p2, 1, 0 }
   0xc   : > { %p917_p4 = por %p907_p1, %p74_p0  ;;  %p537_p5 = scmp.ge.s32.totalorder %s849_s14, 1 }
   0xd   : > { %p922_p6 = por %p106_p3, %p74_p0  ;;  %p113_p7 = scmp.lt.s32.totalorder %s849_s14, 3 }
   0xe   : > { %s1133_s19 = scalar_select %p917_p4, 1, 0 }
   0xf   : > { %s1134_s20 = scalar_select %p922_p6, 1, 0 }
  0x10   : > { %p927_p8 = pnand %p537_p5, %p113_p7  ;;  %s851_s22 = smov [#allocation2]  }
  0x11   : > { %s125_s23 = sshll.u32 %s851_s22, 4  ;;  %s31_s25 = sadd.s32 1, %s845_s13  ;;  %s126_s23 = int_to_ptr.vmem [resolvable:$true] %s125_s23 }
  0x12   : > { %s1135_s21 = scalar_select %p927_p8, 1, 0 }
  0x13   : > { %p603_p9 = pneg %p927_p8  ;;  %s705_s28 = scalar_lea.hbm %s1124_s0, 512 }
  0x14   : > { %p706_p12 = scmp.ne.s32.totalorder %s1124_s0, %s705_s28  ;;  %p712_p5 = scmp.lt.u32.totalorder %s705_s28, %s1124_s0 }
  0x15   : > { %p936_p11 = pnand %p603_p9, %p907_p1 }
  0x17   : > { %p707_p13 = pneg %p936_p11 }
  0x19   : > { %p708_p0 = pnand %p707_p13, %p706_p12 }
  0x1b   : > { %p709_p3 = pneg %p708_p0 }
  0x1d   : > { %p714_p7 = pnand %p712_p5, %p709_p3 }
  0x1f   : > { %717 = shalt.err (!%p714_p7)
}
  0x20   : > { %s718_s5 = scalar_lea.vmem %s126_s23, 512  ;;  %p726_p4 = scmp.lt.s32.totalorder %s126_s23, %s126_s23 }
  0x21   : > { %p719_p9 = scmp.ne.s32.totalorder %s126_s23, %s718_s5  ;;  %p727_p1 = scmp.lt.s32.totalorder %s718_s5, %s718_s5 }
  0x23   : > { %p721_p10 = pnand %p719_p9, %p707_p13  ;;  %p728_p8 = por %p727_p1, %p726_p4 }
  0x25   : > { %p722_p6 = pneg %p721_p10 }
  0x27   : > { %p729_p2 = pnand %p728_p8, %p722_p6 }
  0x29   : > { %732 = shalt.err (!%p729_p2)
}
  0x2a   : > { %s852_s6 = smov 128   ;;  %s853_s7 = smov 8  }
  0x2b   : > { %606 = dma.hbm_to_vmem [thread:$0]  (!%p936_p11), %s1124_s0, 512, %s126_s23, [#allocation3], %s852_s6, %s852_s6, %s853_s7  }
  0x2c   : > { %p33_p1 = scmp.ge.s32.totalorder %s31_s25, 2  ;;  %s61_s16 = sadd.s32 1, %s837_s11 }
  0x2d   : > { %p68_p2 = scmp.ne.s32.totalorder %s837_s11, %s833_s10  ;;  %p69_p4 = scmp.eq.s32.totalorder %s849_s14, 0 }
  0x2e   : > { %s1151_s25 = smov (%p33_p1, %s31_s25), 0  ;;  %p1137_p8 = scmp.ne.s32.totalorder %s1132_s18, 0 }
  0x2f   : > { %p70_p6 = por %p69_p4, %p68_p2  ;;  %s56_s24 = ssub.s32 %s845_s13, %s1151_s25 }
  0x30   : > { %p968_p10 = por %p1137_p8, %p68_p2  ;;  %p616_p12 = scmp.lt.s32.totalorder %s849_s14, 2 }
  0x31   : > { %p59_p13 = scmp.eq.s32.totalorder %s56_s24, 0  ;;  %s139_s26 = sand.u32 1, %s837_s11  }
  0x32   : > { %s592_s27 = smul.u32 144, %s139_s26  ;;  %p980_p11 = pnand %p616_p12, %p70_p6 }
  0x33   : > { %s977_s28 = scalar_select %p59_p13, %s837_s11, %s61_s16  }
  0x34   : > { %s593_s23 = smul.u32 2304, %s845_s13  ;;  %s143_s29 = scalar_lea.vmem [#allocation5], %s592_s27 }
  0x35   : > { %s152_s30 = sshll.u32 %s143_s29, 4  ;;  %s991_s8 = scalar_lea.sflag [#allocation6], %s139_s26  ;;  %s989_s30 = int_to_ptr.vmem [resolvable:$true] %s152_s30 }
  0x36   : > { %s987_s5 = scalar_lea.hbm %s1125_s1, %s593_s23  ;;  %p735_p3 = pneg %p980_p11 }
  0x37   : > { %s733_s15 = scalar_lea.hbm %s987_s5, 2304  ;;  %s738_s27 = scalar_lea.hbm %s1125_s1, 4608 }
  0x38   : > { %p734_p0 = scmp.ne.s32.totalorder %s987_s5, %s733_s15  ;;  %p739_p9 = scmp.lt.u32.totalorder %s987_s5, %s1125_s1 }
  0x39   : > { %p740_p1 = scmp.lt.u32.totalorder %s738_s27, %s733_s15  ;;  %p742_p4 = scmp.lt.u32.totalorder %s733_s15, %s987_s5 }
  0x3a   : > { %p736_p5 = pnand %p735_p3, %p734_p0 }
  0x3b   : > { %p741_p2 = por %p740_p1, %p739_p9 }
  0x3c   : > { %p737_p7 = pneg %p736_p5 }
  0x3d   : > { %p743_p6 = por %p742_p4, %p741_p2 }
  0x3f   : > { %p744_p8 = pnand %p743_p6, %p737_p7 }
  0x41   : > { %747 = shalt.err (!%p744_p8)
}
  0x42   : > { %s748_s26 = scalar_lea.vmem %s989_s30, 2304  ;;  %s854_s4 = smov [#allocation5]  }
  0x43   : > { %p749_p12 = scmp.ne.s32.totalorder %s989_s30, %s748_s26  ;;  %s753_s18 = sshll.u32 %s854_s4, 4  ;;  %s754_s18 = int_to_ptr.vmem [resolvable:$false] %s753_s18 }
  0x44   : > { %s755_s16 = scalar_lea.vmem %s754_s18, 4608  ;;  %p756_p5 = scmp.lt.s32.totalorder %s989_s30, %s754_s18 }
  0x45   : > { %p751_p13 = pnand %p749_p12, %p735_p3  ;;  %p757_p9 = scmp.lt.s32.totalorder %s755_s16, %s748_s26 }
  0x47   : > { %p752_p0 = pneg %p751_p13  ;;  %p758_p1 = por %p757_p9, %p756_p5 }
  0x49   : > { %p759_p2 = pnand %p758_p1, %p752_p0 }
  0x4b   : > { %762 = shalt.err (!%p759_p2)
}
  0x4c   : > { %610 = dma.hbm_to_vmem [thread:$0]  (!%p980_p11), %s987_s5, 2304, %s989_s30, %s991_s8, %s852_s6, %s852_s6, %s853_s7  }
  0x4d   : > { %p1140_p3 = scmp.ne.s32.totalorder %s1135_s21, 0 }
  0x4e   : > { %p1141_p7 = scmp.ne.s32.totalorder (!%p1140_p3), %s1131_s17, 0 }
  0x4f   : > { %164 = sbr.rel (%p1140_p3) target bundleno = 365 (0x16d), region = 28 }
  0x56   : > { %816 = dma.done.wait (%p1141_p7), [#allocation3], 512  }
  0x57   : > { %818 = vsyncadd (%p1141_p7), [#allocation3], 4294966784  ;;  %s1029_s15 = sand.u32 1, %s833_s10   ;;  %p1142_p11 = scmp.ne.s32.totalorder %s1133_s19, 0 }
  0x58   : > { %s594_s3 = smul.u32 144, %s1029_s15  ;;  %s171_s24 = scalar_lea.sflag [#allocation6], %s1029_s15 }
  0x5a   : > { %s1033_s27 = scalar_lea.vmem [#allocation5], %s594_s3 }
  0x5b   : > { %820 = dma.done.wait (%p1142_p11), %s171_s24, 2304  }
  0x5c   : > { %822 = vsyncadd (%p1142_p11), %s171_s24, 4294964992  ;;  %v672_v0 = vld [vmem:[%s1033_s27 + $0x4] ss:$8 sps:$4 sm:$0xff]   ;;  %v674_v1 = vld [vmem:[%s1033_s27] ss:$8 sps:$4 sm:$0xff]   ;;  %vm328_vm0 = vcmask 130048  }
  0x5d   : > { %335 = vmatprep.subr.bf16.mxu0 %v672_v0  ;;  %574 = vmatprep.subr.bf16.mxu1 %v672_v0  ;;  %v675_v2 = vld [vmem:[%s1033_s27 + $0x14] ss:$8 sps:$4 sm:$0xff]   ;;  %v677_v3 = vld [vmem:[%s1033_s27 + $0x10] ss:$8 sps:$4 sm:$0xff]   ;;  %v678_v4 = vld [vmem:[%s1033_s27 + $0x24] ss:$8 sps:$4 sm:$0xff]  }
  0x5e   : > { %336 = vmatpush1.bf16.msra.mxu0 %v674_v1  ;;  %583 = vmatpush1.bf16.msra.mxu1 %v674_v1  ;;  %v680_v5 = vld [vmem:[%s1033_s27 + $0x20] ss:$8 sps:$4 sm:$0xff]   ;;  %v681_v6 = vld [vmem:[%s1033_s27 + $0x34] ss:$8 sps:$4 sm:$0xff]   ;;  %v683_v7 = vld [vmem:[%s1033_s27 + $0x30] ss:$8 sps:$4 sm:$0xff]  }
  0x5f   : > { %337 = vmatprep.subr.bf16.mxu0 %v675_v2  ;;  %575 = vmatprep.subr.bf16.mxu1 %v675_v2  ;;  %v684_v8 = vld [vmem:[%s1033_s27 + $0x44] ss:$8 sps:$4 sm:$0xff]   ;;  %v686_v11 = vld [vmem:[%s1033_s27 + $0x40] ss:$8 sps:$4 sm:$0xff]   ;;  %v687_v12 = vld [vmem:[%s1033_s27 + $0x54] ss:$8 sps:$4 sm:$0xff]  }
  0x60   : > { %v701_v9 = vld [vmem:[#allocation2 + $0x4] ss:$8 sps:$4 sm:$0xff]   ;;  %v704_v10 = vld [vmem:[#allocation2 + $0x14] ss:$8 sps:$4 sm:$0xff]   ;;  %v689_v13 = vld [vmem:[%s1033_s27 + $0x50] ss:$8 sps:$4 sm:$0xff]  }
  0x61   : > { %566 = vmatprep.mubr.msk.bf16.mxu0 %vm328_vm0, %v701_v9  ;;  %567 = vmatprep.mubr.msk.bf16.mxu1 %vm328_vm0, %v704_v10  ;;  %v690_v14 = vld [vmem:[%s1033_s27 + $0x64] ss:$8 sps:$4 sm:$0xff]   ;;  %v692_v15 = vld [vmem:[%s1033_s27 + $0x60] ss:$8 sps:$4 sm:$0xff]   ;;  %v693_v16 = vld [vmem:[%s1033_s27 + $0x74] ss:$8 sps:$4 sm:$0xff]  }
  0x62   : > { %338 = vmatpush1.bf16.msra.mxu0 %v677_v3  ;;  %584 = vmatpush1.bf16.msra.mxu1 %v677_v3  ;;  %v695_v17 = vld [vmem:[%s1033_s27 + $0x70] ss:$8 sps:$4 sm:$0xff]   ;;  %v696_v18 = vld [vmem:[%s1033_s27 + $0x84] ss:$8 sps:$4 sm:$0xff]   ;;  %v698_v19 = vld [vmem:[%s1033_s27 + $0x80] ss:$8 sps:$4 sm:$0xff]  }
  0x63   : > { %339 = vmatprep.subr.bf16.mxu0 %v678_v4  ;;  %576 = vmatprep.subr.bf16.mxu1 %v678_v4  ;;  %v699_v20 = vld [vmem:[#allocation2] ss:$8 sps:$4 sm:$0xff]   ;;  %v702_v21 = vld [vmem:[#allocation2 + $0x10] ss:$8 sps:$4 sm:$0xff]   ;;  %s543_s17 = sshll.u32 %s1029_s15, 6  ;;  %s573_s6 = sshll.u32 %s841_s12, 10 }
  0x64   : > { %s1058_s19 = scalar_lea.vmem [#allocation7], %s543_s17  ;;  %s1072_s30 = scalar_lea.hbm %s1126_s2, %s573_s6 }
  0x65   : > { %s436_s21 = sshll.u32 %s1058_s19, 4  ;;  %s421_s5 = scalar_lea.sflag [#allocation4], %s1029_s15  ;;  %s1064_s21 = int_to_ptr.vmem [resolvable:$true] %s436_s21 }
  0x66   : > { %340 = vmatpush1.bf16.msra.mxu0 %v680_v5  ;;  %585 = vmatpush1.bf16.msra.mxu1 %v680_v5  ;;  %s763_s8 = scalar_lea.vmem %s1064_s21, 1024  ;;  %s855_s23 = smov [#allocation7]  }
  0x67   : > { %341 = vmatprep.subr.bf16.mxu0 %v681_v6  ;;  %577 = vmatprep.subr.bf16.mxu1 %v681_v6  ;;  %p764_p4 = scmp.ne.s32.totalorder %s1064_s21, %s763_s8  ;;  %s767_s29 = sshll.u32 %s855_s23, 4  ;;  %s768_s29 = int_to_ptr.vmem [resolvable:$false] %s767_s29 }
  0x68   : > { %s769_s26 = scalar_lea.vmem %s768_s29, 2048  ;;  %p770_p12 = scmp.lt.s32.totalorder %s1064_s21, %s768_s29 }
  0x69   : > { %p765_p6 = pnand %p764_p4, %p968_p10  ;;  %p771_p13 = scmp.lt.s32.totalorder %s769_s26, %s763_s8 }
  0x6a   : > { %342 = vmatpush1.bf16.msra.mxu0 %v683_v7  ;;  %586 = vmatpush1.bf16.msra.mxu1 %v683_v7 }
  0x6b   : > { %343 = vmatprep.subr.bf16.mxu0 %v684_v8  ;;  %578 = vmatprep.subr.bf16.mxu1 %v684_v8  ;;  %p766_p8 = pneg %p765_p6  ;;  %p772_p0 = por %p771_p13, %p770_p12 }
  0x6d   : > { %p773_p5 = pnand %p772_p0, %p766_p8 }
  0x6e   : > { %344 = vmatpush1.bf16.msra.mxu0 %v686_v11  ;;  %587 = vmatpush1.bf16.msra.mxu1 %v686_v11 }
  0x6f   : > { %345 = vmatprep.subr.bf16.mxu0 %v687_v12  ;;  %579 = vmatprep.subr.bf16.mxu1 %v687_v12 }
  0x72   : > { %346 = vmatpush1.bf16.msra.mxu0 %v689_v13  ;;  %588 = vmatpush1.bf16.msra.mxu1 %v689_v13 }
  0x73   : > { %347 = vmatprep.subr.bf16.mxu0 %v690_v14  ;;  %580 = vmatprep.subr.bf16.mxu1 %v690_v14 }
  0x76   : > { %348 = vmatpush1.bf16.msra.mxu0 %v692_v15  ;;  %589 = vmatpush1.bf16.msra.mxu1 %v692_v15 }
  0x77   : > { %349 = vmatprep.subr.bf16.mxu0 %v693_v16  ;;  %581 = vmatprep.subr.bf16.mxu1 %v693_v16 }
  0x7a   : > { %350 = vmatpush1.bf16.msra.mxu0 %v695_v17  ;;  %590 = vmatpush1.bf16.msra.mxu1 %v695_v17 }
  0x7b   : > { %351 = vmatprep.subr.bf16.mxu0 %v696_v18  ;;  %582 = vmatprep.subr.bf16.mxu1 %v696_v18 }
  0x7e   : > { %352 = vmatpush1.bf16.msra.mxu0 %v698_v19  ;;  %591 = vmatpush1.bf16.msra.mxu1 %v698_v19 }
  0x81   : > { %368 = vmatmul.mubr.bf16.vlgmr.msra.gmra.mrb[0].mxu0 %v699_v20  ;;  %378 = vmatmul.mubr.bf16.vlgmr.msra.gmra.mrb[0].mxu1 %v702_v21 }
 0x154   : > { %v369_v22 = vpop.f32.mrb[0].mxu0  ;;  %v379_v23 = vpop.f32.mrb[0].mxu1 }
 0x155   : > { %vm388_vm1 = vcmp.ge.f32.partialorder %v369_v22, 0.0  ;;  %v396_v24 = vmul.f32 0.01, %v369_v22  ;;  %vm392_vm2 = vcmp.ge.f32.partialorder %v379_v23, 0.0  ;;  %v400_v25 = vmul.f32 0.01, %v379_v23 }
 0x156   : > { %v371_v26 = vpop.f32.mrb[1].mxu0  ;;  %v381_v27 = vpop.f32.mrb[1].mxu1 }
 0x157   : > { %v404_v28 = vsel %vm388_vm1, %v369_v22, %v396_v24  ;;  %v408_v29 = vsel %vm392_vm2, %v379_v23, %v400_v25  ;;  %vm389_vm3 = vcmp.ge.f32.partialorder %v371_v26, 0.0  ;;  %v397_v30 = vmul.f32 0.01, %v371_v26  ;;  %v373_v31 = vpop.f32.mrb[2].mxu0  ;;  %v383_v32 = vpop.f32.mrb[2].mxu1 }
 0x158   : > { %412 = vst [vmem:[%s1058_s19] sm:$0xff] %v404_v28  ;;  %416 = vst [vmem:[%s1058_s19 + $0x20] sm:$0xff] %v408_v29  ;;  %vm393_vm4 = vcmp.ge.f32.partialorder %v381_v27, 0.0  ;;  %v401_v33 = vmul.f32 0.01, %v381_v27  ;;  %vm390_vm5 = vcmp.ge.f32.partialorder %v373_v31, 0.0  ;;  %vm394_vm6 = vcmp.ge.f32.partialorder %v383_v32, 0.0 }
 0x159   : > { %v398_v34 = vmul.f32 0.01, %v373_v31  ;;  %v405_v35 = vsel %vm389_vm3, %v371_v26, %v397_v30  ;;  %v402_v36 = vmul.f32 0.01, %v383_v32  ;;  %v375_v37 = vpop.f32.mrb[3].mxu0  ;;  %v385_v38 = vpop.f32.mrb[3].mxu1 }
 0x15a   : > { %413 = vst [vmem:[%s1058_s19 + $0x8] sm:$0xff] %v405_v35  ;;  %v409_v39 = vsel %vm393_vm4, %v381_v27, %v401_v33  ;;  %vm391_vm7 = vcmp.ge.f32.partialorder %v375_v37, 0.0  ;;  %v399_v41 = vmul.f32 0.01, %v375_v37  ;;  %vm395_vm8 = vcmp.ge.f32.partialorder %v385_v38, 0.0 }
 0x15b   : > { %v406_v40 = vsel %vm390_vm5, %v373_v31, %v398_v34  ;;  %417 = vst [vmem:[%s1058_s19 + $0x28] sm:$0xff] %v409_v39  ;;  %v410_v42 = vsel %vm394_vm6, %v383_v32, %v402_v36  ;;  %v403_v43 = vmul.f32 0.01, %v385_v38 }
 0x15c   : > { %414 = vst [vmem:[%s1058_s19 + $0x10] sm:$0xff] %v406_v40  ;;  %418 = vst [vmem:[%s1058_s19 + $0x30] sm:$0xff] %v410_v42  ;;  %v407_v44 = vsel %vm391_vm7, %v375_v37, %v399_v41 }
 0x15d   : > { %415 = vst [vmem:[%s1058_s19 + $0x18] sm:$0xff] %v407_v44  ;;  %v411_v45 = vsel %vm395_vm8, %v385_v38, %v403_v43 }
 0x15e   : > { %419 = vst [vmem:[%s1058_s19 + $0x38] sm:$0xff] %v411_v45 }
 0x15f   : > { %776 = shalt.err (!%p773_p5)
}
 0x160   : > { %s777_s4 = scalar_lea.hbm %s1072_s30, 1024  ;;  %s781_s3 = scalar_lea.hbm %s1126_s2, 2048 }
 0x161   : > { %p778_p9 = scmp.ne.s32.totalorder %s1072_s30, %s777_s4  ;;  %p782_p3 = scmp.lt.u32.totalorder %s1072_s30, %s1126_s2 }
 0x162   : > { %p783_p7 = scmp.lt.u32.totalorder %s781_s3, %s777_s4  ;;  %p785_p4 = scmp.lt.u32.totalorder %s777_s4, %s1072_s30 }
 0x163   : > { %p779_p1 = pnand %p778_p9, %p968_p10 }
 0x164   : > { %p784_p11 = por %p783_p7, %p782_p3 }
 0x165   : > { %p780_p2 = pneg %p779_p1 }
 0x166   : > { %p786_p6 = por %p785_p4, %p784_p11 }
 0x168   : > { %p787_p8 = pnand %p786_p6, %p780_p2 }
 0x16a   : > { %790 = shalt.err (!%p787_p8)
}
 0x16b   : > { %s856_s17 = smov 256   ;;  %s857_s19 = smov 16  }
 0x16c   : > { %601 = dma.vmem_to_hbm [thread:$0]  (%p968_p10), %s1064_s21, 1024, %s1072_s30, %s421_s5, %s856_s17, %s856_s17, %s857_s19  }
 0x16d PF: > { %s451_s6 = sand.u32 1, %s829_s9   ;;  %p1143_p12 = scmp.ne.s32.totalorder %s1134_s20, 0 }
 0x16e   : > { %p1144_p13 = scmp.ge.s32.totalorder %s849_s14, 2  ;;  %s452_s12 = scalar_lea.sflag [#allocation4], %s451_s6 }
 0x170   : > { %p612_p0 = pnand %p1144_p13, %p1143_p12 }
 0x172   : > { %824 = dma.done.wait (!%p612_p0), %s452_s12, 1024  }
 0x173   : > { %826 = vsyncadd (!%p612_p0), %s452_s12, 4294966272  ;;  %s19_s14 = sadd.s32 1, %s849_s14   ;;  %s1145_s9 = smov %s833_s10 }
 0x174   : > { %p16_p5 = scmp.ge.s32.totalorder %s19_s14, 4   ;;  %s1146_s10 = smov %s837_s11 }
 0x175   : > { %s1147_s11 = smov %s977_s28  ;;  %s1148_s12 = smov %s845_s13 }
 0x176   : > { %s1149_s13 = smov %s1151_s25  ;;  %18 = sbr.rel (!%p16_p5) target bundleno = 7 (0x7), region = 78 }
 0x17d   :  { %457 = vsyncpa [#allocation3], 1 }
 0x17e   :  { %459 = vsyncpa [#allocation3 + $0x1], 1 }
 0x17f   :  { %460 = vsyncpa [#allocation6], 1 }
 0x180   :  { %462 = vsyncpa [#allocation6 + $0x1], 1 }
 0x181   :  { %463 = vsyncpa [#allocation4], 1 }
 0x182   :  { %465 = vsyncpa [#allocation4 + $0x1], 1 }

</bundles_post_ra>
